<compile_context>
chip_gen: v7x
topology: tpu7x:2x2x1
jax: 0.10.0
libtpu: 0.0.40
codegen_flags: <defaults>
</compile_context>

<pallas_src>
import functools

import jax
import jax.numpy as jnp
from jax.experimental import pallas as pl
from jax.experimental.pallas import tpu as pltpu


def _round_up(x: int, m: int) -> int:
    return ((x + m - 1) // m) * m


def md2_kernel(src_ref, tgt_ref, out_ref,
               sum_s, sumsq_s, sum_t, sumsq_t,
               *, n_src: int, true_batch: int, n_pairs: int):
    # src_ref: (S, tB, tD), tgt_ref: (tB, tD), out_ref: (1, tD)
    b = pl.program_id(1)

    @pl.when(b == 0)
    def _init():
        sum_s[...] = jnp.zeros_like(sum_s)
        sumsq_s[...] = jnp.zeros_like(sumsq_s)
        sum_t[...] = jnp.zeros_like(sum_t)
        sumsq_t[...] = jnp.zeros_like(sumsq_t)

    src = src_ref[...].astype(jnp.float32)          # (S, tB, tD)
    tgt = tgt_ref[...].astype(jnp.float32)          # (tB, tD)

    # Accumulate raw first/second moments over the batch (sublane) axis.
    sum_s[...] += jnp.sum(src, axis=1)              # (S, tD)
    sumsq_s[...] += jnp.sum(src * src, axis=1)      # (S, tD)
    sum_t[...] += jnp.sum(tgt, axis=0, keepdims=True)        # (1, tD)
    sumsq_t[...] += jnp.sum(tgt * tgt, axis=0, keepdims=True)

    @pl.when(b == pl.num_programs(1) - 1)
    def _finalize():
        inv_b = jnp.float32(1.0 / true_batch)
        avg_s = sum_s[...] * inv_b                  # (S, tD)  E[x]
        var_s = sumsq_s[...] * inv_b                # (S, tD)  E[x^2]
        avg_t = sum_t[...] * inv_b                  # (1, tD)
        var_t = sumsq_t[...] * inv_b

        # source <-> target squared diffs, summed over domains (per lane).
        da = avg_s - avg_t
        dv = var_s - var_t
        st = jnp.sum(da * da + dv * dv, axis=0, keepdims=True)   # (1, tD)

        # pairwise source <-> source via the sum-of-pairs identity (per lane):
        #   sum_{i<j} (a_i - a_j)^2 = S * sum_i a_i^2 - (sum_i a_i)^2
        s_f = jnp.float32(n_src)
        sa = jnp.sum(avg_s, axis=0, keepdims=True)
        sv = jnp.sum(var_s, axis=0, keepdims=True)
        ss = (s_f * jnp.sum(avg_s * avg_s, axis=0, keepdims=True) - sa * sa
              + s_f * jnp.sum(var_s * var_s, axis=0, keepdims=True) - sv * sv)

        out_ref[...] = st / s_f + ss / jnp.float32(n_pairs)


def md2_loss(source_stacked, target, *, tb=None, td=None):
    """source_stacked: (S, B, D), target: (B, D) -> scalar loss (float32)."""
    S, B, D = source_stacked.shape
    assert target.shape == (B, D)
    assert S >= 2, "pairwise term requires at least 2 source domains"
    n_pairs = S * (S - 1) // 2

    # ---- tile selection (re-derived to fit the smallest VMEM budget) ----
    if td is None:
        td = min(_round_up(D, 128), 512)
    if tb is None:
        tb = min(_round_up(B, 8), 512)
        # double-buffered input tiles: 2 * (S src + 1 tgt) * tb * td * 4 bytes
        while 2 * (S + 1) * tb * td * 4 > (16 << 20) and tb > 8:
            tb //= 2
    assert tb % 8 == 0 and td % 128 == 0

    Bp = _round_up(B, tb)
    Dp = _round_up(D, td)
    if (Bp, Dp) != (B, D):
        # Zero padding is exact: raw sums are unchanged, divisor is the true B,
        # and padded D lanes have zero moments on both sides of every diff.
        source_stacked = jnp.pad(source_stacked,
                                 ((0, 0), (0, Bp - B), (0, Dp - D)))
        target = jnp.pad(target, ((0, Bp - B), (0, Dp - D)))

    n_d, n_b = Dp // td, Bp // tb
    itemsize = jnp.dtype(source_stacked.dtype).itemsize
    vmem_need = (2 * (S + 1) * tb * td * itemsize      # double-buffered inputs
                 + 2 * td * 4                           # output block
                 + 4 * (S + 1) * td * 4                 # scratch accumulators
                 + (4 << 20))                           # headroom
    vmem_limit = int(min(32 << 20, max(vmem_need, 16 << 20)))

    kernel = functools.partial(md2_kernel, n_src=S, true_batch=B,
                               n_pairs=n_pairs)

    out = pl.pallas_call(
        kernel,
        out_shape=jax.ShapeDtypeStruct((1, Dp), jnp.float32),
        grid_spec=pltpu.PrefetchScalarGridSpec(
            num_scalar_prefetch=0,
            grid=(n_d, n_b),                            # reduction (B) axis last
            in_specs=[
                pl.BlockSpec((S, tb, td), lambda d, b: (0, b, d)),
                pl.BlockSpec((tb, td), lambda d, b: (b, d)),
            ],
            out_specs=pl.BlockSpec((1, td), lambda d, b: (0, d)),
            scratch_shapes=[
                pltpu.VMEM((S, td), jnp.float32),   # Σx   per source domain
                pltpu.VMEM((S, td), jnp.float32),   # Σx²  per source domain
                pltpu.VMEM((1, td), jnp.float32),   # Σx   target
                pltpu.VMEM((1, td), jnp.float32),   # Σx²  target
            ],
        ),
        compiler_params=pltpu.CompilerParams(
            dimension_semantics=("parallel", "arbitrary"),
            vmem_limit_bytes=vmem_limit,
        ),
        cost_estimate=pl.CostEstimate(
            flops=3 * (S + 1) * Bp * Dp,
            transcendentals=0,
            bytes_accessed=(S + 1) * Bp * Dp * itemsize + Dp * 4,
        ),
    )(source_stacked, target)

    # Padded D lanes contribute exactly 0; slice anyway for clarity.
    return jnp.sum(out[0, :D])


def md2_loss_ref(source_list, target):
    """Pure-JAX reference mirroring the PyTorch forward exactly."""
    avg_source = [jnp.sum(s, axis=0) / s.shape[0] for s in source_list]
    var_source = [jnp.sum(s ** 2, axis=0) / s.shape[0] for s in source_list]
    avg_target = jnp.sum(target, axis=0) / target.shape[0]
    var_target = jnp.sum(target ** 2, axis=0) / target.shape[0]
    loss_avg_st = sum(jnp.sum((a - avg_target) ** 2) for a in avg_source)
    loss_var_st = sum(jnp.sum((v - var_target) ** 2) for v in var_source)
    loss_avg_ss, loss_var_ss, n = 0.0, 0.0, 0
    for i in range(len(avg_source) - 1):
        for j in range(i + 1, len(avg_source)):
            loss_avg_ss += jnp.sum((avg_source[i] - avg_source[j]) ** 2)
            loss_var_ss += jnp.sum((var_source[i] - var_source[j]) ** 2)
            n += 1
    return (loss_avg_st + loss_var_st) / len(source_list) \
         + (loss_avg_ss + loss_var_ss) / n


if __name__ == "__main__":
    # MD2 has no parameters; only inputs are needed.
    # Small but deliberately non-aligned shapes to exercise the tiled path
    # (B-tile accumulation across the grid + zero-padding of B and D).
    S, B, D = 3, 40, 200
    key = jax.random.PRNGKey(0)
    k_src, k_tgt = jax.random.split(key)
    source_stacked = jax.random.normal(k_src, (S, B, D), dtype=jnp.float32)
    target = jax.random.normal(k_tgt, (B, D), dtype=jnp.float32)

    # Force small tiles so the demo actually runs a (2, 3) grid with a
    # multi-step B reduction; production sizes use the auto-derived tiles.
    loss = jax.block_until_ready(md2_loss(source_stacked, target, tb=16, td=128))

    # Correctness check against a plain-JAX transcription of the PyTorch code.
    source_list = [source_stacked[i] for i in range(S)]
    ref = jax.block_until_ready(md2_loss_ref(source_list, target))
    assert jnp.allclose(loss, ref, rtol=1e-5, atol=1e-5), (loss, ref)

    # Also check the default (auto-tile) path on an aligned shape.
    S2, B2, D2 = 3, 64, 256
    src2 = jax.random.normal(jax.random.PRNGKey(1), (S2, B2, D2), jnp.float32)
    tgt2 = jax.random.normal(jax.random.PRNGKey(2), (B2, D2), jnp.float32)
    loss2 = jax.block_until_ready(md2_loss(src2, tgt2))
    ref2 = jax.block_until_ready(
        md2_loss_ref([src2[i] for i in range(S2)], tgt2))
    assert jnp.allclose(loss2, ref2, rtol=1e-5, atol=1e-5), (loss2, ref2)

    print("KERNEL_OK")
</pallas_src>

<mosaic_0001>
module attributes {stable_mosaic.version = 11 : i64} {
  func.func @md2_kernel(%arg0: i32, %arg1: i32, %arg2: memref<3x16x128xf32, #tpu.memory_space<vmem>>, %arg3: memref<16x128xf32, #tpu.memory_space<vmem>>, %arg4: memref<1x128xf32, #tpu.memory_space<vmem>>, %arg5: memref<3x128xf32, #tpu.memory_space<vmem>>, %arg6: memref<3x128xf32, #tpu.memory_space<vmem>>, %arg7: memref<1x128xf32, #tpu.memory_space<vmem>>, %arg8: memref<1x128xf32, #tpu.memory_space<vmem>>) attributes {dimension_semantics = [#tpu.dimension_semantics<parallel>, #tpu.dimension_semantics<arbitrary>], iteration_bounds = array<i64: 2, 3>, scalar_prefetch = 0 : i64, scratch_operands = 4 : i64, tpu.core_type = #tpu.core_type<tc>, window_params = [{transform_indices = @transform_0, window_bounds = array<i64: 3, 16, 128>}, {transform_indices = @transform_1, window_bounds = array<i64: 16, 128>}, {transform_indices = @transform_2, window_bounds = array<i64: 1, 128>}]} {
    %c0_i32 = arith.constant 0 : i32
    %0 = arith.cmpi eq, %arg1, %c0_i32 : i32
    %1 = arith.extui %0 : i1 to i32
    %c0_i32_0 = arith.constant 0 : i32
    %2 = arith.cmpi ne, %1, %c0_i32_0 : i32
    scf.if %2 {
      %cst_25 = arith.constant 0.000000e+00 : f32
      %28 = vector.broadcast %cst_25 : f32 to vector<3x128xf32>
      %c0_26 = arith.constant 0 : index
      %c0_27 = arith.constant 0 : index
      %29 = vector.load %arg5[%c0_26, %c0_27] : memref<3x128xf32, #tpu.memory_space<vmem>>, vector<3x128xf32>
      tpu.vector_store %arg5[%c0_26, %c0_27], %28 {strides = array<i32>} : memref<3x128xf32, #tpu.memory_space<vmem>>, vector<3x128xf32>,
      %cst_28 = arith.constant 0.000000e+00 : f32
      %30 = vector.broadcast %cst_28 : f32 to vector<3x128xf32>
      %c0_29 = arith.constant 0 : index
      %c0_30 = arith.constant 0 : index
      %31 = vector.load %arg6[%c0_29, %c0_30] : memref<3x128xf32, #tpu.memory_space<vmem>>, vector<3x128xf32>
      tpu.vector_store %arg6[%c0_29, %c0_30], %30 {strides = array<i32>} : memref<3x128xf32, #tpu.memory_space<vmem>>, vector<3x128xf32>,
      %cst_31 = arith.constant 0.000000e+00 : f32
      %32 = vector.broadcast %cst_31 : f32 to vector<1x128xf32>
      %c0_32 = arith.constant 0 : index
      %c0_33 = arith.constant 0 : index
      %33 = vector.load %arg7[%c0_32, %c0_33] : memref<1x128xf32, #tpu.memory_space<vmem>>, vector<1x128xf32>
      tpu.vector_store %arg7[%c0_32, %c0_33], %32 {strides = array<i32>} : memref<1x128xf32, #tpu.memory_space<vmem>>, vector<1x128xf32>,
      %cst_34 = arith.constant 0.000000e+00 : f32
      %34 = vector.broadcast %cst_34 : f32 to vector<1x128xf32>
      %c0_35 = arith.constant 0 : index
      %c0_36 = arith.constant 0 : index
      %35 = vector.load %arg8[%c0_35, %c0_36] : memref<1x128xf32, #tpu.memory_space<vmem>>, vector<1x128xf32>
      tpu.vector_store %arg8[%c0_35, %c0_36], %34 {strides = array<i32>} : memref<1x128xf32, #tpu.memory_space<vmem>>, vector<1x128xf32>,
    } else {
    }
    %c0 = arith.constant 0 : index
    %c0_1 = arith.constant 0 : index
    %c0_2 = arith.constant 0 : index
    %3 = vector.load %arg2[%c0, %c0_1, %c0_2] : memref<3x16x128xf32, #tpu.memory_space<vmem>>, vector<3x16x128xf32>
    %c0_3 = arith.constant 0 : index
    %c0_4 = arith.constant 0 : index
    %4 = vector.load %arg3[%c0_3, %c0_4] : memref<16x128xf32, #tpu.memory_space<vmem>>, vector<16x128xf32>
    %c0_5 = arith.constant 0 : index
    %c0_6 = arith.constant 0 : index
    %5 = vector.load %arg5[%c0_5, %c0_6] : memref<3x128xf32, #tpu.memory_space<vmem>>, vector<3x128xf32>
    %cst = arith.constant dense<0.000000e+00> : vector<3x128xf32>
    %6 = vector.multi_reduction <add>, %3, %cst [1] : vector<3x16x128xf32> to vector<3x128xf32>
    %7 = arith.addf %5, %6 : vector<3x128xf32>
    %c0_7 = arith.constant 0 : index
    %c0_8 = arith.constant 0 : index
    %8 = vector.load %arg5[%c0_7, %c0_8] : memref<3x128xf32, #tpu.memory_space<vmem>>, vector<3x128xf32>
    tpu.vector_store %arg5[%c0_7, %c0_8], %7 {strides = array<i32>} : memref<3x128xf32, #tpu.memory_space<vmem>>, vector<3x128xf32>,
    %c0_9 = arith.constant 0 : index
    %c0_10 = arith.constant 0 : index
    %9 = vector.load %arg6[%c0_9, %c0_10] : memref<3x128xf32, #tpu.memory_space<vmem>>, vector<3x128xf32>
    %10 = arith.mulf %3, %3 : vector<3x16x128xf32>
    %cst_11 = arith.constant dense<0.000000e+00> : vector<3x128xf32>
    %11 = vector.multi_reduction <add>, %10, %cst_11 [1] : vector<3x16x128xf32> to vector<3x128xf32>
    %12 = arith.addf %9, %11 : vector<3x128xf32>
    %c0_12 = arith.constant 0 : index
    %c0_13 = arith.constant 0 : index
    %13 = vector.load %arg6[%c0_12, %c0_13] : memref<3x128xf32, #tpu.memory_space<vmem>>, vector<3x128xf32>
    tpu.vector_store %arg6[%c0_12, %c0_13], %12 {strides = array<i32>} : memref<3x128xf32, #tpu.memory_space<vmem>>, vector<3x128xf32>,
    %c0_14 = arith.constant 0 : index
    %c0_15 = arith.constant 0 : index
    %14 = vector.load %arg7[%c0_14, %c0_15] : memref<1x128xf32, #tpu.memory_space<vmem>>, vector<1x128xf32>
    %cst_16 = arith.constant dense<0.000000e+00> : vector<128xf32>
    %15 = vector.multi_reduction <add>, %4, %cst_16 [0] : vector<16x128xf32> to vector<128xf32>
    %16 = vector.shape_cast %15 : vector<128xf32> to vector<1x128xf32>
    %17 = arith.addf %14, %16 : vector<1x128xf32>
    %c0_17 = arith.constant 0 : index
    %c0_18 = arith.constant 0 : index
    %18 = vector.load %arg7[%c0_17, %c0_18] : memref<1x128xf32, #tpu.memory_space<vmem>>, vector<1x128xf32>
    tpu.vector_store %arg7[%c0_17, %c0_18], %17 {strides = array<i32>} : memref<1x128xf32, #tpu.memory_space<vmem>>, vector<1x128xf32>,
    %c0_19 = arith.constant 0 : index
    %c0_20 = arith.constant 0 : index
    %19 = vector.load %arg8[%c0_19, %c0_20] : memref<1x128xf32, #tpu.memory_space<vmem>>, vector<1x128xf32>
    %20 = arith.mulf %4, %4 : vector<16x128xf32>
    %cst_21 = arith.constant dense<0.000000e+00> : vector<128xf32>
    %21 = vector.multi_reduction <add>, %20, %cst_21 [0] : vector<16x128xf32> to vector<128xf32>
    %22 = vector.shape_cast %21 : vector<128xf32> to vector<1x128xf32>
    %23 = arith.addf %19, %22 : vector<1x128xf32>
    %c0_22 = arith.constant 0 : index
    %c0_23 = arith.constant 0 : index
    %24 = vector.load %arg8[%c0_22, %c0_23] : memref<1x128xf32, #tpu.memory_space<vmem>>, vector<1x128xf32>
    tpu.vector_store %arg8[%c0_22, %c0_23], %23 {strides = array<i32>} : memref<1x128xf32, #tpu.memory_space<vmem>>, vector<1x128xf32>,
    %c2_i32 = arith.constant 2 : i32
    %25 = arith.cmpi eq, %arg1, %c2_i32 : i32
    %26 = arith.extui %25 : i1 to i32
    %c0_i32_24 = arith.constant 0 : i32
    %27 = arith.cmpi ne, %26, %c0_i32_24 : i32
    scf.if %27 {
      %c0_25 = arith.constant 0 : index
      %c0_26 = arith.constant 0 : index
      %28 = vector.load %arg5[%c0_25, %c0_26] : memref<3x128xf32, #tpu.memory_space<vmem>>, vector<3x128xf32>
      %cst_27 = arith.constant 2.500000e-02 : f32
      %29 = vector.broadcast %cst_27 : f32 to vector<3x128xf32>
      %30 = arith.mulf %28, %29 : vector<3x128xf32>
      %c0_28 = arith.constant 0 : index
      %c0_29 = arith.constant 0 : index
      %31 = vector.load %arg6[%c0_28, %c0_29] : memref<3x128xf32, #tpu.memory_space<vmem>>, vector<3x128xf32>
      %cst_30 = arith.constant 2.500000e-02 : f32
      %32 = vector.broadcast %cst_30 : f32 to vector<3x128xf32>
      %33 = arith.mulf %31, %32 : vector<3x128xf32>
      %c0_31 = arith.constant 0 : index
      %c0_32 = arith.constant 0 : index
      %34 = vector.load %arg7[%c0_31, %c0_32] : memref<1x128xf32, #tpu.memory_space<vmem>>, vector<1x128xf32>
      %cst_33 = arith.constant 2.500000e-02 : f32
      %35 = vector.broadcast %cst_33 : f32 to vector<1x128xf32>
      %36 = arith.mulf %34, %35 : vector<1x128xf32>
      %c0_34 = arith.constant 0 : index
      %c0_35 = arith.constant 0 : index
      %37 = vector.load %arg8[%c0_34, %c0_35] : memref<1x128xf32, #tpu.memory_space<vmem>>, vector<1x128xf32>
      %cst_36 = arith.constant 2.500000e-02 : f32
      %38 = vector.broadcast %cst_36 : f32 to vector<1x128xf32>
      %39 = arith.mulf %37, %38 : vector<1x128xf32>
      %40 = vector.broadcast %36 : vector<1x128xf32> to vector<3x128xf32>
      %41 = arith.subf %30, %40 : vector<3x128xf32>
      %42 = vector.broadcast %39 : vector<1x128xf32> to vector<3x128xf32>
      %43 = arith.subf %33, %42 : vector<3x128xf32>
      %44 = arith.mulf %41, %41 : vector<3x128xf32>
      %45 = arith.mulf %43, %43 : vector<3x128xf32>
      %46 = arith.addf %44, %45 : vector<3x128xf32>
      %cst_37 = arith.constant dense<0.000000e+00> : vector<128xf32>
      %47 = vector.multi_reduction <add>, %46, %cst_37 [0] : vector<3x128xf32> to vector<128xf32>
      %48 = vector.shape_cast %47 : vector<128xf32> to vector<1x128xf32>
      %cst_38 = arith.constant dense<0.000000e+00> : vector<128xf32>
      %49 = vector.multi_reduction <add>, %30, %cst_38 [0] : vector<3x128xf32> to vector<128xf32>
      %50 = vector.shape_cast %49 : vector<128xf32> to vector<1x128xf32>
      %cst_39 = arith.constant dense<0.000000e+00> : vector<128xf32>
      %51 = vector.multi_reduction <add>, %33, %cst_39 [0] : vector<3x128xf32> to vector<128xf32>
      %52 = vector.shape_cast %51 : vector<128xf32> to vector<1x128xf32>
      %53 = arith.mulf %30, %30 : vector<3x128xf32>
      %cst_40 = arith.constant dense<0.000000e+00> : vector<128xf32>
      %54 = vector.multi_reduction <add>, %53, %cst_40 [0] : vector<3x128xf32> to vector<128xf32>
      %55 = vector.shape_cast %54 : vector<128xf32> to vector<1x128xf32>
      %cst_41 = arith.constant 3.000000e+00 : f32
      %56 = vector.broadcast %cst_41 : f32 to vector<1x128xf32>
      %57 = arith.mulf %56, %55 : vector<1x128xf32>
      %58 = arith.mulf %50, %50 : vector<1x128xf32>
      %59 = arith.subf %57, %58 : vector<1x128xf32>
      %60 = arith.mulf %33, %33 : vector<3x128xf32>
      %cst_42 = arith.constant dense<0.000000e+00> : vector<128xf32>
      %61 = vector.multi_reduction <add>, %60, %cst_42 [0] : vector<3x128xf32> to vector<128xf32>
      %62 = vector.shape_cast %61 : vector<128xf32> to vector<1x128xf32>
      %cst_43 = arith.constant 3.000000e+00 : f32
      %63 = vector.broadcast %cst_43 : f32 to vector<1x128xf32>
      %64 = arith.mulf %63, %62 : vector<1x128xf32>
      %65 = arith.addf %59, %64 : vector<1x128xf32>
      %66 = arith.mulf %52, %52 : vector<1x128xf32>
      %67 = arith.subf %65, %66 : vector<1x128xf32>
      %cst_44 = arith.constant 3.000000e+00 : f32
      %68 = vector.broadcast %cst_44 : f32 to vector<1x128xf32>
      %69 = arith.divf %48, %68 : vector<1x128xf32>
      %cst_45 = arith.constant 3.000000e+00 : f32
      %70 = vector.broadcast %cst_45 : f32 to vector<1x128xf32>
      %71 = arith.divf %67, %70 : vector<1x128xf32>
      %72 = arith.addf %69, %71 : vector<1x128xf32>
      %c0_46 = arith.constant 0 : index
      %c0_47 = arith.constant 0 : index
      %73 = vector.load %arg4[%c0_46, %c0_47] : memref<1x128xf32, #tpu.memory_space<vmem>>, vector<1x128xf32>
      tpu.vector_store %arg4[%c0_46, %c0_47], %72 {strides = array<i32>} : memref<1x128xf32, #tpu.memory_space<vmem>>, vector<1x128xf32>,
    } else {
    }
    return
  }
  func.func @transform_0(%arg0: i32, %arg1: i32) -> (i32, i32, i32) {
    %c0_i32 = arith.constant 0 : i32
    %c0_i32_0 = arith.constant 0 : i32
    return %c0_i32, %arg1, %arg0 : i32, i32, i32
  }
  func.func @transform_1(%arg0: i32, %arg1: i32) -> (i32, i32) {
    %c0_i32 = arith.constant 0 : i32
    return %arg1, %arg0 : i32, i32
  }
  func.func @transform_2(%arg0: i32, %arg1: i32) -> (i32, i32) {
    %c0_i32 = arith.constant 0 : i32
    %c0_i32_0 = arith.constant 0 : i32
    return %c0_i32, %arg0 : i32, i32
  }
}

</mosaic_0001>

<bundles_post_ra>
// kernel: tpu_custom_call.1
= control target key start
LH: loop header
LB: loop body
LE: loop exit
PB: predicated region body
PF: predicated region fallthrough
CT: control target
= control target key end

     0   :  { %s1125_s0 = inlined_call_operand.hbm [shape: f32[3,48,256], index: 0, kind: input, shape index: {}]   ;;  %s1126_s1 = inlined_call_operand.hbm [shape: f32[48,256], index: 1, kind: input, shape index: {}]   ;;  %s1127_s2 = inlined_call_operand.hbm [shape: f32[1,256], index: 2, kind: output, shape index: {}]  }
   0x1   :  { %1132 = sst [smem:[#allocation22_spill]] %s1125_s0 }
   0x2   :  { %7 = vsyncpa [#allocation7], 0 }
   0x3   :  { %9 = vsyncpa [#allocation7 + $0x1], 0 }
   0x4   :  { %10 = vsyncpa [#allocation10], 0 }
   0x5   :  { %12 = vsyncpa [#allocation10 + $0x1], 0 }
   0x6   :  { %13 = vsyncpa [#allocation8], 0 }
   0x7   :  { %15 = vsyncpa [#allocation8 + $0x1], 0  ;;  %s873_s9 = smov 0   ;;  %s875_s10 = smov 0  }
   0x8   :  { %s877_s11 = smov 0   ;;  %s879_s12 = smov 0  }
   0x9   :  { %s881_s13 = smov 0   ;;  %s883_s14 = smov 0  }
   0xa   :  { %s885_s15 = smov 0   ;;  %s887_s16 = smov 0  }
   0xb   :  { %s889_s17 = smov 0   ;;  %s891_s18 = smov 0  }
   0xc   :  { %s893_s19 = smov 0  }
   0xd LB: > { %1133 = sst [smem:[#allocation18_spill]] %s836_s17  ;;  %s550_s20 = sadd.s32 4294967295, %s844_s19   ;;  %s844_s19 = sphi %s893_s19, %s21_s19   ;;  %s840_s18 = sphi %s891_s18, %s1155_s18   ;;  %s836_s17 = sphi %s889_s17, %s1146_s17   ;;  %s832_s16 = sphi %s887_s16, %s1154_s16   ;;  %s828_s15 = sphi %s885_s15, %s1145_s15   ;;  %s824_s14 = sphi %s883_s14, %s1153_s14   ;;  %s820_s13 = sphi %s881_s13, %s1152_s13   ;;  %s816_s12 = sphi %s879_s12, %s1151_s12   ;;  %s812_s11 = sphi %s877_s11, %s1150_s11   ;;  %s808_s10 = sphi %s875_s10, %s1149_s10   ;;  %s804_s9 = sphi %s873_s9, %s1148_s9  }
   0xe   : > { %s551_s21 = sadd.s32 4294967294, %s844_s19   ;;  %s30_s22 = sadd.s32 1, %s836_s17 }
   0xf   : > { %s33_s23 = sadd.s32 1, %s840_s18  ;;  %p31_p0 = scmp.ge.s32.totalorder %s30_s22, 3 }
  0x10   : > { %s42_s24 = sadd.s32 1, %s824_s14  ;;  %p49_p1 = scmp.ne.s32.totalorder %s824_s14, %s820_s13 }
  0x11   : > { %p50_p2 = scmp.eq.s32.totalorder %s844_s19, 0  ;;  %s1157_s22 = smov (%p31_p0, %s30_s22), 0 }
  0x12   : > { %1134 = sst [smem:[#allocation19_spill]] %s1157_s22  ;;  %s1159_s23 = smov (!%p31_p0, %s33_s23), %s840_s18 }
  0x13   : > { %s37_s25 = ssub.s32 %s836_s17, %s1157_s22  ;;  %p939_p3 = por %p50_p2, %p49_p1 }
  0x14   : > { %p35_p4 = scmp.ge.s32.totalorder %s1159_s23, 2  ;;  %p55_p5 = scmp.ne.s32.totalorder %s820_s13, %s816_s12 }
  0x15   : > { %p56_p6 = scmp.eq.s32.totalorder %s550_s20, 0  ;;  %s96_s27 = sadd.s32 1, %s812_s11 }
  0x16   : > { %s1161_s23 = smov (%p35_p4, %s1159_s23), 0  ;;  %p106_p8 = scmp.ne.s32.totalorder %s812_s11, %s808_s10 }
  0x17   : > { %1136 = sst [smem:[#allocation20_spill]] %s1161_s23  ;;  %p947_p7 = por %p56_p6, %p55_p5 }
  0x18   : > { %s38_s29 = ssub.s32 %s840_s18, %s1161_s23  ;;  %p107_p9 = scmp.eq.s32.totalorder %s550_s20, 5 }
  0x19   : > { %s39_s30 = sor.u32 %s38_s29, %s37_s25  ;;  %p94_p10 = scmp.eq.s32.totalorder %s38_s29, 0 }
  0x1a   : > { %p40_p11 = scmp.eq.s32.totalorder %s39_s30, 0  ;;  %p955_p12 = por %p107_p9, %p106_p8 }
  0x1b   : > { %s960_s4 = scalar_select %p94_p10, %s812_s11, %s96_s27  }
  0x1c   : > { %s1138_s3 = scalar_select %p955_p12, 1, 0 }
  0x1d   : > { %s963_s5 = scalar_select %p40_p11, %s824_s14, %s42_s24  }
  0x1e   : > { %p112_p13 = scmp.ne.s32.totalorder %s808_s10, %s804_s9  ;;  %p113_p0 = scmp.eq.s32.totalorder %s551_s21, 5 }
  0x1f   : > { %1139 = sst [smem:[#allocation21_spill]] %s963_s5  ;;  %p553_p2 = scmp.ge.s32.totalorder %s844_s19, 6 }
  0x20   : > { %p967_p1 = por %p113_p0, %p112_p13 }
  0x21   : > { %129 = sbr.rel (%p553_p2) target bundleno = 81 (0x51), region = 16 }
  0x22   : > { %s1140_s6 = scalar_select %p967_p1, 1, 0 }
  0x28   : > { %s973_s7 = sand.u32 1, %s824_s14   ;;  %s570_s8 = sshll.u32 %s836_s17, 2 }
  0x29   : > { %s572_s12 = smul.u32 48, %s973_s7  ;;  %s143_s20 = sadd.s32 %s840_s18, %s570_s8 }
  0x2a   : > { %s556_s21 = sshll.u32 %s143_s20, 7  ;;  %s1141_s0 = sld [smem:[#allocation22_spill]] }
  0x2b   : > { %s574_s29 = scalar_select %p939_p3, [#allocation0], [#allocation14] }
  0x2c   : > { %s137_s30 = scalar_lea.vmem [#allocation6], %s572_s12  ;;  %s846_s22 = smov 1536  }
  0x2d   : > { %s158_s23 = sshll.u32 %s137_s30, 4  ;;  %575 = sst [smem:[#allocation13]] (%p939_p3), %s846_s22  ;;  %s159_s23 = int_to_ptr.vmem [resolvable:$true] %s158_s23 }
  0x2e   : > { %s150_s5 = sld [smem:[%s574_s29]]   ;;  %s847_s17 = smov 256  }
  0x2f   : > { %576 = sst [smem:[#allocation13 + $0x1]] (%p939_p3), %s847_s17  ;;  %s848_s8 = smov 2  }
  0x30   : > { %s145_s27 = scalar_lea.hbm %s1141_s0, %s556_s21  ;;  %577 = sst [smem:[#allocation13 + $0x2]] (%p939_p3), %s848_s8 }
  0x31   : > { %578 = sst [smem:[#allocation13 + $0x3]] (%p939_p3), %s847_s17  ;;  %s849_s20 = smov 128  }
  0x32   : > { %579 = sst [smem:[#allocation13 + $0x4]] (%p939_p3), %s849_s20  ;;  %s850_s12 = smov 8  }
  0x33   : > { %580 = sst [smem:[#allocation13 + $0x5]] (%p939_p3), %s850_s12  ;;  %s134_s22 = scalar_lea.sflag [#allocation7], %s973_s7 }
  0x34   : > { %s557_s24 = sshll.u32 %s150_s5, 26  ;;  %s851_s30 = smov [#allocation12]  }
  0x35   : > { %s558_s25 = sadd.s32 134217728, %s557_s24  ;;  %s559_s29 = sshll.u32 %s973_s7, 4 }
  0x36   : > { %581 = dma.general (%p939_p3), %s145_s27, 768, %s159_s23, %s134_s22, %s851_s30, [#allocation13], %s558_s25, 0  }
  0x37   : > { %s1002_s17 = scalar_lea.hbm %s1126_s1, %s556_s21  ;;  %s185_s20 = scalar_lea.vmem [#allocation9], %s559_s29 }
  0x38   : > { %s194_s5 = sshll.u32 %s185_s20, 4  ;;  %s182_s12 = scalar_lea.sflag [#allocation10], %s973_s7  ;;  %s1004_s5 = int_to_ptr.vmem [resolvable:$true] %s194_s5 }
  0x39   : > { %s690_s24 = scalar_lea.hbm %s1002_s17, 256  ;;  %s694_s0 = scalar_lea.hbm %s1126_s1, 1536 }
  0x3a   : > { %p691_p4 = scmp.ne.s32.totalorder %s1002_s17, %s690_s24  ;;  %p695_p8 = scmp.lt.u32.totalorder %s1002_s17, %s1126_s1 }
  0x3b   : > { %p696_p9 = scmp.lt.u32.totalorder %s694_s0, %s690_s24  ;;  %p698_p11 = scmp.lt.u32.totalorder %s690_s24, %s1002_s17 }
  0x3c   : > { %p692_p5 = pnand %p691_p4, %p939_p3 }
  0x3d   : > { %p697_p10 = por %p696_p9, %p695_p8 }
  0x3e   : > { %p693_p6 = pneg %p692_p5 }
  0x3f   : > { %p699_p13 = por %p698_p11, %p697_p10 }
  0x41   : > { %p700_p0 = pnand %p699_p13, %p693_p6 }
  0x43   : > { %703 = shalt.err (!%p700_p0)
}
  0x44   : > { %s704_s22 = scalar_lea.vmem %s1004_s5, 256  ;;  %s852_s30 = smov [#allocation9]  }
  0x45   : > { %p705_p2 = scmp.ne.s32.totalorder %s1004_s5, %s704_s22  ;;  %s708_s29 = sshll.u32 %s852_s30, 4  ;;  %s709_s29 = int_to_ptr.vmem [resolvable:$false] %s708_s29 }
  0x46   : > { %s710_s8 = scalar_lea.vmem %s709_s29, 512  ;;  %p711_p1 = scmp.lt.s32.totalorder %s1004_s5, %s709_s29 }
  0x47   : > { %p706_p4 = pnand %p705_p2, %p939_p3  ;;  %p712_p12 = scmp.lt.s32.totalorder %s710_s8, %s704_s22 }
  0x49   : > { %p707_p5 = pneg %p706_p4  ;;  %p713_p8 = por %p712_p12, %p711_p1 }
  0x4b   : > { %p714_p9 = pnand %p713_p8, %p707_p5 }
  0x4d   : > { %717 = shalt.err (!%p714_p9)
}
  0x4e   : > { %s853_s20 = smov 256   ;;  %s854_s24 = smov 128  }
  0x4f   : > { %s855_s23 = smov 8  }
  0x50   : > { %582 = dma.hbm_to_vmem [thread:$0]  (%p939_p3), %s1002_s17, 256, %s1004_s5, %s182_s12, %s853_s20, %s854_s24, %s855_s23  }
  0x51 PF: > { %p563_p6 = scmp.ge.s32.totalorder %s844_s19, 1  ;;  %p202_p10 = scmp.lt.s32.totalorder %s844_s19, 7 }
  0x53   : > { %p203_p11 = pnand %p563_p6, %p202_p10 }
  0x54   : > { %s208_s27 = sand.u32 (!%p203_p11), 1, %s820_s13  }
  0x55   : > { %206 = sbr.rel (%p203_p11) target bundleno = 189 (0xbd), region = 28  ;;  %s209_s21 = scalar_lea.sflag (!%p203_p11), [#allocation7], %s208_s27 }
  0x56   : > { %s573_s0 = smul.u32 (!%p203_p11), 48, %s208_s27 }
  0x58   : > { %s212_s25 = scalar_lea.vmem (!%p203_p11), [#allocation6], %s573_s0 }
  0x5c   : > { %791 = dma.done.wait (%p947_p7), %s209_s21, 768  }
  0x5d   : > { %793 = vsyncadd (%p947_p7), %s209_s21, 4294966528  ;;  %s564_s26 = sshll.u32 %s208_s27, 4  ;;  %s218_s7 = scalar_lea.sflag [#allocation10], %s208_s27 }
  0x5e   : > { %s1037_s17 = scalar_lea.vmem [#allocation9], %s564_s26 }
  0x5f   : > { %795 = dma.done.wait (%p947_p7), %s218_s7, 256  }
  0x60   : > { %797 = vsyncadd (%p947_p7), %s218_s7, 4294967040  ;;  %s244_s5 = sand.u32 1, %s808_s10   ;;  %p565_p3 = scmp.ne.s32.totalorder %s828_s15, 0 }
  0x61   : > { %s1046_s12 = scalar_lea.vmem [#allocation11], %s244_s5  ;;  %v856_v0 = vmov (!%p565_p3), 0.0  }
  0x62   : > { %251 = sbr.rel (%p565_p3) target bundleno = 105 (0x69), region = 40  ;;  %252 = vst [vmem:[#allocation2] sm:$0x7] (!%p565_p3), %v856_v0  ;;  %253 = vst [vmem:[#allocation3] sm:$0x7] (!%p565_p3), %v856_v0 }
  0x63   : > { %254 = vst [vmem:[#allocation4] sm:$0x1] (!%p565_p3), %v856_v0  ;;  %255 = vst [vmem:[#allocation5] sm:$0x1] (!%p565_p3), %v856_v0 }
  0x69 PF: > { %v256_v1 = vld [vmem:[%s212_s25] sm:$0xff]  ;;  %v257_v2 = vld [vmem:[%s212_s25 + $0x8] sm:$0xff]  ;;  %v258_v3 = vld [vmem:[%s212_s25 + $0x10] sm:$0xff]  ;;  %vm289_vm0 = vcmask 1041409   ;;  %vm291_vm1 = vcmask 1042434   ;;  %p566_p7 = scmp.ne.s32.totalorder %s828_s15, 2 }
  0x6a   : > { %v259_v4 = vld [vmem:[%s212_s25 + $0x18] sm:$0xff]  ;;  %v260_v5 = vld [vmem:[%s212_s25 + $0x20] sm:$0xff]  ;;  %v261_v6 = vld [vmem:[%s212_s25 + $0x28] sm:$0xff]  ;;  %v265_v7 = vadd.f32 %v257_v2, %v256_v1  ;;  %v297_v8 = vmul.f32 %v256_v1, %v256_v1  ;;  %v298_v9 = vmul.f32 %v257_v2, %v257_v2  ;;  %v299_v10 = vmul.f32 %v258_v3, %v258_v3 }
  0x6b   : > { %v272_v11 = vadd.f32 %v259_v4, %v258_v3  ;;  %v279_v12 = vadd.f32 %v261_v6, %v260_v5  ;;  %v300_v13 = vmul.f32 %v259_v4, %v259_v4  ;;  %v301_v14 = vmul.f32 %v260_v5, %v260_v5  ;;  %v262_v15 = vld [vmem:[%s1037_s17] sm:$0xff]  ;;  %v263_v19 = vld [vmem:[%s1037_s17 + $0x8] sm:$0xff] }
  0x6c   : > { %v266_v16 = vrot.slane %v265_v7, 4  ;;  %v302_v17 = vmul.f32 %v261_v6, %v261_v6  ;;  %v303_v18 = vadd.f32 %v298_v9, %v297_v8  ;;  %v343_v20 = vmul.f32 %v262_v15, %v262_v15  ;;  %v264_v1 = vld [vmem:[#allocation2] sm:$0x7]  ;;  %v332_v4 = vld [vmem:[#allocation4] sm:$0x1] }
  0x6d   : > { %v273_v21 = vrot.slane %v272_v11, 4  ;;  %v280_v22 = vrot.slane %v279_v12, 4  ;;  %v310_v23 = vadd.f32 %v300_v13, %v299_v10  ;;  %v333_v24 = vadd.f32 %v263_v19, %v262_v15  ;;  %v296_v10 = vld [vmem:[#allocation3] sm:$0x7] }
  0x6e   : > { %v267_v25 = vadd.f32 %v266_v16, %v265_v7  ;;  %v304_v26 = vrot.slane %v303_v18, 4  ;;  %v317_v27 = vadd.f32 %v302_v17, %v301_v14  ;;  %v344_v28 = vmul.f32 %v263_v19, %v263_v19  ;;  %v342_v16 = vld [vmem:[#allocation5] sm:$0x1] }
  0x6f   : > { %v274_v29 = vadd.f32 %v273_v21, %v272_v11  ;;  %v281_v30 = vadd.f32 %v280_v22, %v279_v12  ;;  %v311_v31 = vrot.slane %v310_v23, 4  ;;  %v334_v32 = vrot.slane %v333_v24, 4 }
  0x70   : > { %v268_v33 = vrot.slane %v267_v25, 2  ;;  %v305_v34 = vadd.f32 %v304_v26, %v303_v18  ;;  %v318_v35 = vrot.slane %v317_v27, 4  ;;  %v345_v36 = vadd.f32 %v344_v28, %v343_v20 }
  0x71   : > { %v275_v37 = vrot.slane %v274_v29, 2  ;;  %v282_v38 = vrot.slane %v281_v30, 2  ;;  %v312_v39 = vadd.f32 %v311_v31, %v310_v23  ;;  %v335_v40 = vadd.f32 %v334_v32, %v333_v24 }
  0x72   : > { %v269_v41 = vadd.f32 %v268_v33, %v267_v25  ;;  %v306_v42 = vrot.slane %v305_v34, 2  ;;  %v319_v43 = vadd.f32 %v318_v35, %v317_v27  ;;  %v346_v44 = vrot.slane %v345_v36, 4 }
  0x73   : > { %v276_v45 = vadd.f32 %v275_v37, %v274_v29  ;;  %v283_v46 = vadd.f32 %v282_v38, %v281_v30  ;;  %v313_v47 = vrot.slane %v312_v39, 2  ;;  %v336_v48 = vrot.slane %v335_v40, 2 }
  0x74   : > { %v270_v49 = vrot.slane %v269_v41, 1  ;;  %v307_v50 = vadd.f32 %v306_v42, %v305_v34  ;;  %v320_v51 = vrot.slane %v319_v43, 2  ;;  %v347_v52 = vadd.f32 %v346_v44, %v345_v36 }
  0x75   : > { %v277_v53 = vrot.slane %v276_v45, 1  ;;  %v284_v54 = vrot.slane %v283_v46, 1  ;;  %v314_v55 = vadd.f32 %v313_v47, %v312_v39  ;;  %v337_v56 = vadd.f32 %v336_v48, %v335_v40 }
  0x76   : > { %v271_v57 = vadd.f32 %v270_v49, %v269_v41  ;;  %v308_v58 = vrot.slane %v307_v50, 1  ;;  %v321_v59 = vadd.f32 %v320_v51, %v319_v43  ;;  %v348_v60 = vrot.slane %v347_v52, 2 }
  0x77   : > { %v278_v61 = vadd.f32 %v277_v53, %v276_v45  ;;  %v285_v62 = vadd.f32 %v284_v54, %v283_v46  ;;  %v315_v63 = vrot.slane %v314_v55, 1  ;;  %v338_v0 = vrot.slane %v337_v56, 1 }
  0x78   : > { %v309_v2 = vadd.f32 %v308_v58, %v307_v50  ;;  %v322_v3 = vrot.slane %v321_v59, 1  ;;  %v349_v5 = vadd.f32 %v348_v60, %v347_v52  ;;  %v367_v24 = vlaneseq (!%p566_p7) }
  0x79   : > { %v290_v6 = vsel %vm289_vm0, %v278_v61, %v271_v57  ;;  %v316_v7 = vadd.f32 %v315_v63, %v314_v55  ;;  %v339_v8 = vadd.f32 %v338_v0, %v337_v56  ;;  %vm383_vm2 = vcmask (!%p566_p7), 1042432  }
  0x7a   : > { %v292_v9 = vsel %vm291_vm1, %v285_v62, %v290_v6  ;;  %v323_v11 = vadd.f32 %v322_v3, %v321_v59  ;;  %v350_v12 = vrot.slane %v349_v5, 1  ;;  %357 = sbr.rel (%p566_p7) target bundleno = 164 (0xa4), region = 44  ;;  %v368_v29 = vshrl.u32 (!%p566_p7), %v367_v24, 7 }
  0x7b   : > { %v294_v13 = vadd.f32 %v292_v9, %v264_v1  ;;  %v327_v14 = vsel %vm289_vm0, %v316_v7, %v309_v2  ;;  %v340_v15 = vadd.f32 %v339_v8, %v332_v4 }
  0x7c   : > { %v328_v17 = vsel %vm291_vm1, %v323_v11, %v327_v14  ;;  %v351_v18 = vadd.f32 %v350_v12, %v349_v5  ;;  %v369_v34 = vsub.s32 (!%p566_p7), 0, %v368_v29 }
  0x7d   : > { %295 = vst [vmem:[#allocation2] sm:$0x7] %v294_v13  ;;  %v330_v19 = vadd.f32 %v328_v17, %v296_v10  ;;  %341 = vst [vmem:[#allocation4] sm:$0x1] %v340_v15 }
  0x7e   : > { %v352_v20 = vadd.f32 %v351_v18, %v342_v16 }
  0x7f   : > { %331 = vst [vmem:[#allocation3] sm:$0x7] %v330_v19 }
  0x80   : > { %353 = vst [vmem:[#allocation5] sm:$0x1] %v352_v20 }
  0x84   : > { %v358_v21 = vld [vmem:[#allocation2] sm:$0x7]  ;;  %v362_v23 = vld [vmem:[#allocation4] sm:$0x1] }
  0x85   : > { %v359_v25 = vmul.f32 0.025, %v358_v21  ;;  %v363_v27 = vmul.f32 0.025, %v362_v23 }
  0x86   : > { %v360_v22 = vld [vmem:[#allocation3] sm:$0x7] }
  0x87   : > { %v361_v26 = vmul.f32 0.025, %v360_v22  ;;  %v364_v28 = vld [vmem:[#allocation5] sm:$0x1]  ;;  %v391_v31 = vsel %vm383_vm2, %v359_v25, 0.0  ;;  %v405_v33 = vmul.f32 %v359_v25, %v359_v25  ;;  %v370_v39 = vrot.slane %v363_v27, %v369_v34 }
  0x88   : > { %v365_v30 = vmul.f32 0.025, %v364_v28  ;;  %v392_v35 = vrot.slane %v391_v31, 4 }
  0x89   : > { %v398_v32 = vsel %vm383_vm2, %v361_v26, 0.0  ;;  %v416_v37 = vmul.f32 %v361_v26, %v361_v26  ;;  %v406_v38 = vsel %vm383_vm2, %v405_v33, 0.0  ;;  %v372_v45 = vsub.f32 %v359_v25, %v370_v39 }
  0x8a   : > { %v399_v36 = vrot.slane %v398_v32, 4  ;;  %v377_v40 = vrot.slane %v365_v30, %v369_v34  ;;  %v393_v41 = vadd.f32 %v392_v35, %v391_v31  ;;  %v407_v43 = vrot.slane %v406_v38, 4 }
  0x8b   : > { %v417_v44 = vsel %vm383_vm2, %v416_v37, 0.0  ;;  %v380_v51 = vmul.f32 %v372_v45, %v372_v45 }
  0x8c   : > { %v400_v42 = vadd.f32 %v399_v36, %v398_v32  ;;  %v379_v46 = vsub.f32 %v361_v26, %v377_v40  ;;  %v394_v47 = vrot.slane %v393_v41, 2  ;;  %v408_v49 = vadd.f32 %v407_v43, %v406_v38 }
  0x8d   : > { %v418_v50 = vrot.slane %v417_v44, 4 }
  0x8e   : > { %v401_v48 = vrot.slane %v400_v42, 2  ;;  %v381_v52 = vmul.f32 %v379_v46, %v379_v46  ;;  %v395_v53 = vadd.f32 %v394_v47, %v393_v41  ;;  %v409_v55 = vrot.slane %v408_v49, 2 }
  0x8f   : > { %v419_v56 = vadd.f32 %v418_v50, %v417_v44 }
  0x90   : > { %v402_v54 = vadd.f32 %v401_v48, %v400_v42  ;;  %v382_v57 = vadd.f32 %v381_v52, %v380_v51  ;;  %v396_v58 = vrot.slane %v395_v53, 1  ;;  %v410_v60 = vadd.f32 %v409_v55, %v408_v49 }
  0x91   : > { %v420_v61 = vrot.slane %v419_v56, 2 }
  0x92   : > { %v403_v59 = vrot.slane %v402_v54, 1  ;;  %v384_v62 = vsel %vm383_vm2, %v382_v57, 0.0  ;;  %v397_v63 = vadd.f32 %v396_v58, %v395_v53  ;;  %v411_v1 = vrot.slane %v410_v60, 1 }
  0x93   : > { %v385_v0 = vrot.slane %v384_v62, 4  ;;  %v421_v2 = vadd.f32 %v420_v61, %v419_v56 }
  0x94   : > { %v404_v3 = vadd.f32 %v403_v59, %v402_v54  ;;  %v412_v5 = vadd.f32 %v411_v1, %v410_v60  ;;  %v414_v6 = vmul.f32 %v397_v63, %v397_v63 }
  0x95   : > { %v386_v4 = vadd.f32 %v385_v0, %v384_v62  ;;  %v422_v7 = vrot.slane %v421_v2, 1 }
  0x96   : > { %v413_v9 = vmul.f32 3.0, %v412_v5  ;;  %v426_v14 = vmul.f32 %v404_v3, %v404_v3 }
  0x97   : > { %v387_v8 = vrot.slane %v386_v4, 2  ;;  %v423_v10 = vadd.f32 %v422_v7, %v421_v2 }
  0x98   : > { %v415_v12 = vsub.f32 %v413_v9, %v414_v6 }
  0x99   : > { %v388_v11 = vadd.f32 %v387_v8, %v386_v4  ;;  %v424_v13 = vmul.f32 3.0, %v423_v10 }
  0x9b   : > { %v389_v15 = vrot.slane %v388_v11, 1  ;;  %v425_v16 = vadd.f32 %v424_v13, %v415_v12 }
  0x9d   : > { %v390_v17 = vadd.f32 %v389_v15, %v388_v11  ;;  %v427_v18 = vsub.f32 %v425_v16, %v426_v14 }
  0x9f   : > { %v429_v19 = vmul.f32 0.33333334, %v390_v17  ;;  %v430_v20 = vmul.f32 0.33333334, %v427_v18 }
  0xa1   : > { %v431_v21 = vadd.f32 %v430_v20, %v429_v19 }
  0xa3   : > { %432 = vst [vmem:[%s1046_s12] sm:$0x1] %v431_v21 }
  0xa4 PF: > { %s567_s15 = sshll.u32 %s832_s16, 4  ;;  %s446_s29 = sshll.u32 %s1046_s12, 4  ;;  %s447_s29 = int_to_ptr.vmem [resolvable:$true] %s446_s29 }
  0xa5   : > { %s1066_s30 = scalar_lea.hbm %s1127_s2, %s567_s15  ;;  %s434_s8 = scalar_lea.sflag [#allocation8], %s244_s5 }
  0xa6   : > { %s718_s20 = scalar_lea.vmem %s447_s29, 16  ;;  %p1142_p1 = scmp.ne.s32.totalorder %s1138_s3, 0 }
  0xa7   : > { %p719_p12 = scmp.ne.s32.totalorder %s447_s29, %s718_s20  ;;  %s857_s24 = smov [#allocation11]  }
  0xa8   : > { %s722_s23 = sshll.u32 %s857_s24, 4  ;;  %s723_s23 = int_to_ptr.vmem [resolvable:$false] %s722_s23 }
  0xa9   : > { %p720_p13 = pnand %p719_p12, %p1142_p1  ;;  %s724_s27 = scalar_lea.vmem %s723_s23, 32 }
  0xaa   : > { %p725_p2 = scmp.lt.s32.totalorder %s447_s29, %s723_s23  ;;  %p726_p4 = scmp.lt.s32.totalorder %s724_s27, %s718_s20 }
  0xab   : > { %p721_p0 = pneg %p720_p13 }
  0xac   : > { %p727_p5 = por %p726_p4, %p725_p2 }
  0xae   : > { %p728_p8 = pnand %p727_p5, %p721_p0 }
  0xb0   : > { %731 = shalt.err (!%p728_p8)
}
  0xb1   : > { %s732_s16 = scalar_lea.hbm %s1066_s30, 16  ;;  %s736_s25 = scalar_lea.hbm %s1127_s2, 32 }
  0xb2   : > { %p733_p9 = scmp.ne.s32.totalorder %s1066_s30, %s732_s16  ;;  %p737_p11 = scmp.lt.u32.totalorder %s1066_s30, %s1127_s2 }
  0xb3   : > { %p738_p3 = scmp.lt.u32.totalorder %s736_s25, %s732_s16  ;;  %p740_p12 = scmp.lt.u32.totalorder %s732_s16, %s1066_s30 }
  0xb4   : > { %p734_p6 = pnand %p733_p9, %p1142_p1 }
  0xb5   : > { %p739_p7 = por %p738_p3, %p737_p11 }
  0xb6   : > { %p735_p10 = pneg %p734_p6 }
  0xb7   : > { %p741_p13 = por %p740_p12, %p739_p7 }
  0xb9   : > { %p742_p0 = pnand %p741_p13, %p735_p10 }
  0xbb   : > { %745 = shalt.err (!%p742_p0)
}
  0xbc   : > { %585 = dma.vmem_to_hbm [thread:$0]  (%p1142_p1), %s447_s29, 16, %s1066_s30, %s434_s8  }
  0xbd PF: > { %p591_p2 = scmp.ge.s32.totalorder %s844_s19, 2  ;;  %s458_s17 = sand.u32 1, %s804_s9  }
  0xbe   : > { %p1143_p4 = scmp.ne.s32.totalorder %s1140_s6, 0  ;;  %s459_s5 = scalar_lea.sflag [#allocation8], %s458_s17 }
  0xc0   : > { %p588_p5 = pnand %p591_p2, %p1143_p4 }
  0xc2   : > { %799 = dma.done.wait (!%p588_p5), %s459_s5, 16  }
  0xc3   : > { %801 = vsyncadd (!%p588_p5), %s459_s5, 4294967280  ;;  %s21_s19 = sadd.s32 1, %s844_s19   ;;  %s1144_s3 = sld [smem:[#allocation21_spill]] }
  0xc4   : > { %p18_p8 = scmp.ge.s32.totalorder %s21_s19, 8   ;;  %s1145_s15 = sld [smem:[#allocation18_spill]] }
  0xc5   : > { %s1146_s17 = sld [smem:[#allocation19_spill]]  ;;  %s1147_s28 = sld [smem:[#allocation20_spill]] }
  0xc6   : > { %s1148_s9 = smov %s808_s10  ;;  %s1149_s10 = smov %s812_s11 }
  0xc7   : > { %s1150_s11 = smov %s960_s4  ;;  %s1151_s12 = smov %s820_s13 }
  0xc8   : > { %s1152_s13 = smov %s824_s14  ;;  %s1154_s16 = smov %s840_s18 }
  0xc9   : > { %s1153_s14 = smov %s1144_s3  ;;  %20 = sbr.rel (!%p18_p8) target bundleno = 13 (0xd), region = 99 }
  0xcb   : > { %s1155_s18 = smov %s1147_s28 }
  0xd0   :  { %463 = vsyncpa [#allocation7], 1 }
  0xd1   :  { %465 = vsyncpa [#allocation7 + $0x1], 1 }
  0xd2   :  { %466 = vsyncpa [#allocation10], 1 }
  0xd3   :  { %468 = vsyncpa [#allocation10 + $0x1], 1 }
  0xd4   :  { %469 = vsyncpa [#allocation8], 1 }
  0xd5   :  { %471 = vsyncpa [#allocation8 + $0x1], 1 }

</bundles_post_ra>
